<compile_context>
chip_gen: v7x
topology: tpu7x:2x2x1
jax: 0.10.0
libtpu: 0.0.40
codegen_flags: <defaults>
</compile_context>

<pallas_src>
import jax
import jax.numpy as jnp
from jax.experimental import pallas as pl
from jax.experimental.pallas import tpu as pltpu


def _round_up(n, m):
    return ((n + m - 1) // m) * m


def mlp3lv2_kernel(x_ref,
                   w1_ref, b1_ref,
                   w2_ref, b2_ref,
                   w3_ref, b3_ref,
                   w4_ref, b4_ref,
                   o_ref):
    """One batch tile: (TM, in_features) -> lane-dense (1, TM) logits row."""
    # Hidden layers: MXU matmuls with f32 accumulation; bias/ReLU in f32 on VPU.
    h = jnp.dot(x_ref[...], w1_ref[...], preferred_element_type=jnp.float32)
    h = jnp.maximum(h + b1_ref[...], 0.0)

    h = jnp.dot(h.astype(w2_ref.dtype), w2_ref[...],
                preferred_element_type=jnp.float32)
    h = jnp.maximum(h + b2_ref[...], 0.0)

    h = jnp.dot(h.astype(w3_ref.dtype), w3_ref[...],
                preferred_element_type=jnp.float32)
    h = jnp.maximum(h + b3_ref[...], 0.0)

    # Final layer (out_features == 1): contract the feature axis of BOTH
    # operands, (1, h2) x (TM, h2)^T -> (1, TM), so the result lands lane-dense
    # instead of as a 1-lane column (avoids masked vst.msk stores).
    out = jax.lax.dot_general(
        w4_ref[...], h,
        dimension_numbers=(((1,), (1,)), ((), ())),
        preferred_element_type=jnp.float32)
    o_ref[...] = (out + b4_ref[...]).astype(o_ref.dtype)


def mlp3lv2_forward(x, params, *, block_m=512, use_bf16=True):
    """Forward pass of MLP_3Lv2.

    x: (B, seq_len, channels) float32.
    params: torch-layout weights w1..w4 of shape (out_features, in_features),
            biases b1..b4 of shape (1, out_features).
    Returns logits of shape (B, 1), float32.
    """
    B = x.shape[0]
    x_flat = x.reshape(B, -1)                       # torch.nn.Flatten
    in_features = x_flat.shape[1]

    # Pre-transpose hidden weights to (in, out) so the kernel does x @ W + b
    # (== x @ W.T + b in torch). w4 stays (1, h2): used in the A @ B^T form.
    w1, w2, w3 = params["w1"].T, params["w2"].T, params["w3"].T
    w4 = params["w4"]
    b1, b2, b3, b4 = params["b1"], params["b2"], params["b3"], params["b4"]

    if use_bf16:
        # Halve HBM bytes on the dominant x stream; f32 accumulate in-kernel.
        x_flat = x_flat.astype(jnp.bfloat16)
        w1 = w1.astype(jnp.bfloat16)
        w2 = w2.astype(jnp.bfloat16)
        w3 = w3.astype(jnp.bfloat16)

    # Batch tile: multiple of 128 (natural v5e MXU rows; 512 also suits the
    # 256-row v6e/v7x MXU). Capped so tiny batches don't over-pad. Per-tile VMEM
    # footprint is a few hundred KiB, far under the v7x 64 MiB budget.
    block_m = _round_up(block_m, 128)
    tm = min(block_m, _round_up(B, 128))
    num_tiles = pl.cdiv(B, tm)
    b_pad = num_tiles * tm
    if b_pad != B:
        x_flat = jnp.pad(x_flat, ((0, b_pad - B), (0, 0)))

    # Constant index_map -> block index never changes -> weights/biases are
    # DMA'd once and stay resident in VMEM across all batch tiles.
    resident = lambda shape: pl.BlockSpec(shape, lambda i: (0, 0))

    out_row = pl.pallas_call(
        mlp3lv2_kernel,
        out_shape=jax.ShapeDtypeStruct((1, b_pad), jnp.float32),
        grid=(num_tiles,),
        in_specs=[
            pl.BlockSpec((tm, in_features), lambda i: (i, 0)),
            resident(w1.shape), resident(b1.shape),
            resident(w2.shape), resident(b2.shape),
            resident(w3.shape), resident(b3.shape),
            resident(w4.shape), resident(b4.shape),
        ],
        out_specs=pl.BlockSpec((1, tm), lambda i: (0, i)),
        compiler_params=pltpu.CompilerParams(
            dimension_semantics=("parallel",)),
    )(x_flat, w1, b1, w2, b2, w3, b3, w4, b4)

    return out_row[0, :B].reshape(B, 1)


def mlp3lv2_reference(x, params, compute_dtype=jnp.float32):
    """Pure-JAX reference. compute_dtype=float32 reproduces the exact PyTorch
    forward; compute_dtype=bfloat16 mirrors the kernel's mixed precision."""
    h = x.reshape(x.shape[0], -1)
    for wk, bk in (("w1", "b1"), ("w2", "b2"), ("w3", "b3")):
        w = params[wk].astype(compute_dtype)
        h = jnp.dot(h.astype(compute_dtype), w.T,
                    preferred_element_type=jnp.float32) + params[bk]
        h = jnp.maximum(h, 0.0)
    return jnp.dot(h, params["w4"].T,
                   preferred_element_type=jnp.float32) + params["b4"]


def xavier_uniform(key, out_features, in_features, dtype=jnp.float32):
    # torch.nn.init.xavier_uniform_ (gain=1): U(-a, a), a = sqrt(6/(fan_in+fan_out))
    a = (6.0 / (in_features + out_features)) ** 0.5
    return jax.random.uniform(key, (out_features, in_features), dtype=dtype,
                              minval=-a, maxval=a)


def init_params(key, seq_len, channels, hidden_features=16):
    """Parameters in torch layout: weight (out_features, in_features), bias = 0."""
    in_features = seq_len * channels
    h = hidden_features
    h2 = hidden_features // 2
    k1, k2, k3, k4 = jax.random.split(key, 4)
    return {
        "w1": xavier_uniform(k1, h, in_features),
        "b1": jnp.zeros((1, h), jnp.float32),
        "w2": xavier_uniform(k2, h2, h),
        "b2": jnp.zeros((1, h2), jnp.float32),
        "w3": xavier_uniform(k3, h2, h2),
        "b3": jnp.zeros((1, h2), jnp.float32),
        "w4": xavier_uniform(k4, 1, h2),
        "b4": jnp.zeros((1, 1), jnp.float32),
    }


if __name__ == "__main__":
    seq_len, channels, hidden = 8, 4, 16
    batch = 2

    key = jax.random.PRNGKey(0)
    k_x, k_p, k_x2 = jax.random.split(key, 3)

    params = init_params(k_p, seq_len, channels, hidden)

    # Small case matching the module's typical input (N, seq_len, channels).
    x = jax.random.normal(k_x, (batch, seq_len, channels), dtype=jnp.float32)
    logits = jax.block_until_ready(mlp3lv2_forward(x, params))
    assert logits.shape == (batch, 1)

    # Kernel-matched mixed-precision reference (bf16 inputs, f32 accumulate).
    exp_bf16 = mlp3lv2_reference(x, params, compute_dtype=jnp.bfloat16)
    assert jnp.allclose(logits, exp_bf16, atol=1e-3, rtol=1e-3)
    # Loose sanity check vs. the pure-f32 PyTorch-equivalent forward.
    exp_f32 = mlp3lv2_reference(x, params, compute_dtype=jnp.float32)
    assert jnp.allclose(logits, exp_f32, atol=1e-1, rtol=1e-1)

    # Multi-tile + ragged-tail case: exercises batch tiling, resident weights,
    # the parallel grid axis, and zero-padding of the last tile.
    batch2 = 600
    x2 = jax.random.normal(k_x2, (batch2, seq_len, channels), dtype=jnp.float32)
    logits2 = jax.block_until_ready(mlp3lv2_forward(x2, params))
    exp2 = mlp3lv2_reference(x2, params, compute_dtype=jnp.bfloat16)
    assert logits2.shape == (batch2, 1)
    assert jnp.allclose(logits2, exp2, atol=1e-3, rtol=1e-3)

    print("KERNEL_OK")
</pallas_src>

<mosaic_0001>
module attributes {stable_mosaic.version = 11 : i64} {
  func.func @mlp3lv2_kernel(%arg0: i32, %arg1: memref<128x32xbf16, #tpu.memory_space<vmem>>, %arg2: memref<32x16xbf16, #tpu.memory_space<vmem>>, %arg3: memref<1x16xf32, #tpu.memory_space<vmem>>, %arg4: memref<16x8xbf16, #tpu.memory_space<vmem>>, %arg5: memref<1x8xf32, #tpu.memory_space<vmem>>, %arg6: memref<8x8xbf16, #tpu.memory_space<vmem>>, %arg7: memref<1x8xf32, #tpu.memory_space<vmem>>, %arg8: memref<1x8xf32, #tpu.memory_space<vmem>>, %arg9: memref<1x1xf32, #tpu.memory_space<vmem>>, %arg10: memref<1x128xf32, #tpu.memory_space<vmem>>) attributes {dimension_semantics = [#tpu.dimension_semantics<parallel>], iteration_bounds = array<i64: 1>, scalar_prefetch = 0 : i64, scratch_operands = 0 : i64, tpu.core_type = #tpu.core_type<tc>, window_params = [{transform_indices = @transform_0, window_bounds = array<i64: 128, 32>}, {pipeline_mode = #tpu.pipeline_mode<synchronous>, transform_indices = @transform_1, window_bounds = array<i64: 32, 16>}, {pipeline_mode = #tpu.pipeline_mode<synchronous>, transform_indices = @transform_2, window_bounds = array<i64: 1, 16>}, {pipeline_mode = #tpu.pipeline_mode<synchronous>, transform_indices = @transform_3, window_bounds = array<i64: 16, 8>}, {pipeline_mode = #tpu.pipeline_mode<synchronous>, transform_indices = @transform_4, window_bounds = array<i64: 1, 8>}, {pipeline_mode = #tpu.pipeline_mode<synchronous>, transform_indices = @transform_5, window_bounds = array<i64: 8, 8>}, {pipeline_mode = #tpu.pipeline_mode<synchronous>, transform_indices = @transform_6, window_bounds = array<i64: 1, 8>}, {pipeline_mode = #tpu.pipeline_mode<synchronous>, transform_indices = @transform_7, window_bounds = array<i64: 1, 8>}, {pipeline_mode = #tpu.pipeline_mode<synchronous>, transform_indices = @transform_8, window_bounds = array<i64: 1, 1>}, {transform_indices = @transform_9, window_bounds = array<i64: 1, 128>}]} {
    %c0 = arith.constant 0 : index
    %c0_0 = arith.constant 0 : index
    %0 = vector.load %arg1[%c0, %c0_0] : memref<128x32xbf16, #tpu.memory_space<vmem>>, vector<128x32xbf16>
    %c0_1 = arith.constant 0 : index
    %c0_2 = arith.constant 0 : index
    %1 = vector.load %arg2[%c0_1, %c0_2] : memref<32x16xbf16, #tpu.memory_space<vmem>>, vector<32x16xbf16>
    %cst = arith.constant dense<0.000000e+00> : vector<128x16xf32>
    %2 = tpu.matmul %0, %1, %cst {dimension_numbers = #tpu.dot_dimension_numbers<[1], [0], [0], [1], [0, 0, 1, 1], [], []>} : vector<128x32xbf16>, vector<32x16xbf16>, vector<128x16xf32> -> vector<128x16xf32>
    %c0_3 = arith.constant 0 : index
    %c0_4 = arith.constant 0 : index
    %3 = vector.load %arg3[%c0_3, %c0_4] : memref<1x16xf32, #tpu.memory_space<vmem>>, vector<1x16xf32>
    %4 = vector.broadcast %3 : vector<1x16xf32> to vector<128x16xf32>
    %5 = arith.addf %2, %4 : vector<128x16xf32>
    %cst_5 = arith.constant 0.000000e+00 : f32
    %6 = vector.broadcast %cst_5 : f32 to vector<128x16xf32>
    %7 = arith.maximumf %5, %6 : vector<128x16xf32>
    %8 = arith.truncf %7 : vector<128x16xf32> to vector<128x16xbf16>
    %c0_6 = arith.constant 0 : index
    %c0_7 = arith.constant 0 : index
    %9 = vector.load %arg4[%c0_6, %c0_7] : memref<16x8xbf16, #tpu.memory_space<vmem>>, vector<16x8xbf16>
    %cst_8 = arith.constant dense<0.000000e+00> : vector<128x8xf32>
    %10 = tpu.matmul %8, %9, %cst_8 {dimension_numbers = #tpu.dot_dimension_numbers<[1], [0], [0], [1], [0, 0, 1, 1], [], []>} : vector<128x16xbf16>, vector<16x8xbf16>, vector<128x8xf32> -> vector<128x8xf32>
    %c0_9 = arith.constant 0 : index
    %c0_10 = arith.constant 0 : index
    %11 = vector.load %arg5[%c0_9, %c0_10] : memref<1x8xf32, #tpu.memory_space<vmem>>, vector<1x8xf32>
    %12 = vector.broadcast %11 : vector<1x8xf32> to vector<128x8xf32>
    %13 = arith.addf %10, %12 : vector<128x8xf32>
    %cst_11 = arith.constant 0.000000e+00 : f32
    %14 = vector.broadcast %cst_11 : f32 to vector<128x8xf32>
    %15 = arith.maximumf %13, %14 : vector<128x8xf32>
    %16 = arith.truncf %15 : vector<128x8xf32> to vector<128x8xbf16>
    %c0_12 = arith.constant 0 : index
    %c0_13 = arith.constant 0 : index
    %17 = vector.load %arg6[%c0_12, %c0_13] : memref<8x8xbf16, #tpu.memory_space<vmem>>, vector<8x8xbf16>
    %cst_14 = arith.constant dense<0.000000e+00> : vector<128x8xf32>
    %18 = tpu.matmul %16, %17, %cst_14 {dimension_numbers = #tpu.dot_dimension_numbers<[1], [0], [0], [1], [0, 0, 1, 1], [], []>} : vector<128x8xbf16>, vector<8x8xbf16>, vector<128x8xf32> -> vector<128x8xf32>
    %c0_15 = arith.constant 0 : index
    %c0_16 = arith.constant 0 : index
    %19 = vector.load %arg7[%c0_15, %c0_16] : memref<1x8xf32, #tpu.memory_space<vmem>>, vector<1x8xf32>
    %20 = vector.broadcast %19 : vector<1x8xf32> to vector<128x8xf32>
    %21 = arith.addf %18, %20 : vector<128x8xf32>
    %cst_17 = arith.constant 0.000000e+00 : f32
    %22 = vector.broadcast %cst_17 : f32 to vector<128x8xf32>
    %23 = arith.maximumf %21, %22 : vector<128x8xf32>
    %c0_18 = arith.constant 0 : index
    %c0_19 = arith.constant 0 : index
    %24 = vector.load %arg8[%c0_18, %c0_19] : memref<1x8xf32, #tpu.memory_space<vmem>>, vector<1x8xf32>
    %cst_20 = arith.constant dense<0.000000e+00> : vector<1x128xf32>
    %25 = tpu.matmul %24, %23, %cst_20 {dimension_numbers = #tpu.dot_dimension_numbers<[1], [1], [0], [0], [0, 0, 1, 0], [], []>} : vector<1x8xf32>, vector<128x8xf32>, vector<1x128xf32> -> vector<1x128xf32>
    %c0_21 = arith.constant 0 : index
    %c0_22 = arith.constant 0 : index
    %26 = vector.load %arg9[%c0_21, %c0_22] : memref<1x1xf32, #tpu.memory_space<vmem>>, vector<1x1xf32>
    %27 = vector.broadcast %26 : vector<1x1xf32> to vector<1x128xf32>
    %28 = arith.addf %25, %27 : vector<1x128xf32>
    %c0_23 = arith.constant 0 : index
    %c0_24 = arith.constant 0 : index
    %29 = vector.load %arg10[%c0_23, %c0_24] : memref<1x128xf32, #tpu.memory_space<vmem>>, vector<1x128xf32>
    tpu.vector_store %arg10[%c0_23, %c0_24], %28 {strides = array<i32>} : memref<1x128xf32, #tpu.memory_space<vmem>>, vector<1x128xf32>,
    return
  }
  func.func @transform_0(%arg0: i32) -> (i32, i32) {
    %c0_i32 = arith.constant 0 : i32
    %c0_i32_0 = arith.constant 0 : i32
    return %arg0, %c0_i32 : i32, i32
  }
  func.func @transform_1(%arg0: i32) -> (i32, i32) {
    %c0_i32 = arith.constant 0 : i32
    %c0_i32_0 = arith.constant 0 : i32
    %c0_i32_1 = arith.constant 0 : i32
    return %c0_i32, %c0_i32_0 : i32, i32
  }
  func.func @transform_2(%arg0: i32) -> (i32, i32) {
    %c0_i32 = arith.constant 0 : i32
    %c0_i32_0 = arith.constant 0 : i32
    %c0_i32_1 = arith.constant 0 : i32
    return %c0_i32, %c0_i32_0 : i32, i32
  }
  func.func @transform_3(%arg0: i32) -> (i32, i32) {
    %c0_i32 = arith.constant 0 : i32
    %c0_i32_0 = arith.constant 0 : i32
    %c0_i32_1 = arith.constant 0 : i32
    return %c0_i32, %c0_i32_0 : i32, i32
  }
  func.func @transform_4(%arg0: i32) -> (i32, i32) {
    %c0_i32 = arith.constant 0 : i32
    %c0_i32_0 = arith.constant 0 : i32
    %c0_i32_1 = arith.constant 0 : i32
    return %c0_i32, %c0_i32_0 : i32, i32
  }
  func.func @transform_5(%arg0: i32) -> (i32, i32) {
    %c0_i32 = arith.constant 0 : i32
    %c0_i32_0 = arith.constant 0 : i32
    %c0_i32_1 = arith.constant 0 : i32
    return %c0_i32, %c0_i32_0 : i32, i32
  }
  func.func @transform_6(%arg0: i32) -> (i32, i32) {
    %c0_i32 = arith.constant 0 : i32
    %c0_i32_0 = arith.constant 0 : i32
    %c0_i32_1 = arith.constant 0 : i32
    return %c0_i32, %c0_i32_0 : i32, i32
  }
  func.func @transform_7(%arg0: i32) -> (i32, i32) {
    %c0_i32 = arith.constant 0 : i32
    %c0_i32_0 = arith.constant 0 : i32
    %c0_i32_1 = arith.constant 0 : i32
    return %c0_i32, %c0_i32_0 : i32, i32
  }
  func.func @transform_8(%arg0: i32) -> (i32, i32) {
    %c0_i32 = arith.constant 0 : i32
    %c0_i32_0 = arith.constant 0 : i32
    %c0_i32_1 = arith.constant 0 : i32
    return %c0_i32, %c0_i32_0 : i32, i32
  }
  func.func @transform_9(%arg0: i32) -> (i32, i32) {
    %c0_i32 = arith.constant 0 : i32
    %c0_i32_0 = arith.constant 0 : i32
    return %c0_i32, %arg0 : i32, i32
  }
}

</mosaic_0001>

<bundles_post_ra>
// kernel: tpu_custom_call.1
= control target key start
LH: loop header
LB: loop body
LE: loop exit
PB: predicated region body
PF: predicated region fallthrough
CT: control target
= control target key end

     0   :  { %s1157_s0 = inlined_call_operand.vmem [shape: bf16[128,32], index: 0, kind: input, shape index: {}]   ;;  %s1158_s1 = inlined_call_operand.vmem [shape: bf16[32,16], index: 1, kind: input, shape index: {}]   ;;  %s1159_s2 = inlined_call_operand.vmem [shape: f32[1,16], index: 2, kind: input, shape index: {}]   ;;  %s1160_s3 = inlined_call_operand.vmem [shape: bf16[16,8], index: 3, kind: input, shape index: {}]   ;;  %s1161_s4 = inlined_call_operand.vmem [shape: f32[1,8], index: 4, kind: input, shape index: {}]   ;;  %s1162_s5 = inlined_call_operand.vmem [shape: bf16[8,8], index: 5, kind: input, shape index: {}]   ;;  %s1163_s6 = inlined_call_operand.vmem [shape: f32[1,8], index: 6, kind: input, shape index: {}]   ;;  %s1164_s7 = inlined_call_operand.vmem [shape: f32[1,8], index: 7, kind: input, shape index: {}]   ;;  %s1165_s8 = inlined_call_operand.<no memory space> [shape: f32[1,1], index: 8, kind: input, shape index: {}]   ;;  %s1166_s9 = inlined_call_operand.hbm [shape: f32[1,128], index: 9, kind: output, shape index: {}]  }
   0x1   :  { %v14_v0 = vstv %s1165_s8 }
   0x2   :  { %15 = vst [vmem:[#allocation2] sm:$0x1] %v14_v0 }
   0x3   :  { %v949_v1 = vld [vmem:[%s1158_s1] sm:$0xff]   ;;  %v950_v2 = vld [vmem:[%s1158_s1 + $0x8] sm:$0xff]   ;;  %vm115_vm0 = vcmask 261120   ;;  %v953_v5 = vld [vmem:[%s1157_s0 + $0x10] sm:$0xff]  }
   0x4   :  { %819 = vmatprep.subr.bf16.mxu0 %v949_v1  ;;  %v951_v3 = vld [vmem:[%s1157_s0] sm:$0xff]   ;;  %v952_v4 = vld [vmem:[%s1157_s0 + $0x8] sm:$0xff]  }
   0x5   :  { %820 = vmatpush3.bf16.msra.mxu0 %v949_v1  ;;  %823 = vmatprep.mubr.msk.bf16.mxu0 %vm115_vm0, %v951_v3 }
   0x6   :  { %821 = vmatprep.subr.bf16.mxu0 %v950_v2 }
   0x9   :  { %822 = vmatpush3.bf16.msra.mxu0 %v950_v2 }
   0xc   :  { %824 = vmatmul.mubr.msk.bf16.vlgmr.msra.gmra.mrb[0].mxu0 %vm115_vm0, %v952_v4 }
   0xd   :  { %16 = vsyncpa [#allocation4], 0  ;;  %827 = vmatprep.mubr.msk.bf16.mxu0 %vm115_vm0, %v953_v5  ;;  %v954_v6 = vld [vmem:[%s1157_s0 + $0x18] sm:$0xff]   ;;  %v955_v7 = vld [vmem:[%s1157_s0 + $0x20] sm:$0xff]   ;;  %vm455_vm1 = vcmask 1043456   ;;  %vm276_vm2 = vcmask 130048  }
   0xe   :  { %v956_v8 = vld [vmem:[%s1157_s0 + $0x28] sm:$0xff]   ;;  %v957_v9 = vld [vmem:[%s1157_s0 + $0x30] sm:$0xff]   ;;  %v958_v10 = vld [vmem:[%s1157_s0 + $0x38] sm:$0xff]   ;;  %vm430_vm3 = vcmask 64512   ;;  %vm985_vm4 = vmmov 0   ;;  %s988_s14 = smov [#allocation3]  }
   0xf   :  { %v959_v11 = vld [vmem:[%s1160_s3] sm:$0xff]   ;;  %vm1114_vm5 = vmpackc.low %vm430_vm3, %vm430_vm3  ;;  %s711_s15 = sshll.u32 %s988_s14, 4  ;;  %s712_s15 = int_to_ptr.vmem [resolvable:$true] %s711_s15 }
  0x10   :  { %839 = vmatprep.subr.bf16.mxu1 %v959_v11  ;;  %v422_v12 = vld [vmem:[%s1162_s5] sm:$0xf]  ;;  %s960_s16 = scalar_lea.vmem %s712_s15, 16  ;;  %s964_s8 = scalar_lea.vmem %s712_s15, 32 }
  0x11   :  { %840 = vmatpush3.bf16.msra.mxu1 %v959_v11  ;;  %v457_v13 = vsel %vm455_vm1, %v422_v12, 0  ;;  %v719_v14 = vld [vmem:[%s1159_s2] ss:$0 sm:$0xff]  ;;  %p961_p0 = scmp.ne.s32.totalorder %s712_s15, %s960_s16  ;;  %p965_p1 = scmp.lt.s32.totalorder %s712_s15, %s712_s15 }
  0x12   :  { %942 = vmatprep.subr.msk.bf16.mxu1 %vm455_vm1, %v422_v12  ;;  %p966_p2 = scmp.lt.s32.totalorder %s964_s8, %s960_s16 }
  0x14   :  { %828 = vmatmul.mubr.msk.bf16.gmra.mrb[4].mxu0 %vm115_vm0, %v954_v6  ;;  %p967_p3 = por %p966_p2, %p965_p1 }
  0x15   :  { %831 = vmatprep.mubr.msk.bf16.mxu0 %vm115_vm0, %v955_v7  ;;  %v738_v7 = vld [vmem:[%s1161_s4] ss:$0 sm:$0xff] }
  0x16   :  { %p968_p4 = pnand %p967_p3, %p961_p0 }
  0x1c   :  { %832 = vmatmul.mubr.msk.bf16.gmra.mrb[8].mxu0 %vm115_vm0, %v956_v8 }
  0x1d   :  { %835 = vmatprep.mubr.msk.bf16.mxu0 %vm115_vm0, %v957_v9 }
  0x24   :  { %836 = vmatmul.mubr.msk.bf16.gmra.mrb[12].mxu0 %vm115_vm0, %v958_v10 }
  0xdf   :  { %v825_v15 = vpop.f32.mrb[0].mxu0 }
  0xe0   :  { %v183_v16 = vadd.f32 %v825_v15, %v719_v14  ;;  %v174_v17 = vpop.f32.mrb[1].mxu0 }
  0xe1   :  { %v175_v18 = vadd.f32 %v719_v14, %v174_v17  ;;  %v826_v19 = vpop.f32.mrb[2].mxu0 }
  0xe2   :  { %v186_v20 = vadd.f32 %v826_v19, %v719_v14  ;;  %v177_v21 = vpop.f32.mrb[3].mxu0  ;;  %v239_v23 = vmax.f32 %v183_v16, 0.0 }
  0xe3   :  { %v178_v22 = vadd.f32 %v719_v14, %v177_v21  ;;  %v237_v25 = vmax.f32 %v175_v18, 0.0 }
  0xe4   :  { %v240_v24 = vmax.f32 %v186_v20, 0.0 }
  0xe5   :  { %v238_v26 = vmax.f32 %v178_v22, 0.0 }
  0xe6   :  { %v254_v27 = vpack.c.bf16 %v240_v24, %v239_v23 }
  0xe7   :  { %v829_v28 = vpop.f32.mrb[4].mxu0  ;;  %v253_v29 = vpack.c.bf16 %v238_v26, %v237_v25 }
  0xe8   :  { %v199_v30 = vadd.f32 %v829_v28, %v719_v14  ;;  %v190_v31 = vpop.f32.mrb[5].mxu0 }
  0xe9   :  { %v191_v32 = vadd.f32 %v719_v14, %v190_v31  ;;  %v830_v33 = vpop.f32.mrb[6].mxu0  ;;  %841 = vmatprep.mubr.msk.bf16.mxu1 %vm276_vm2, %v253_v29 }
  0xea   :  { %v243_v34 = vmax.f32 %v199_v30, 0.0  ;;  %v202_v35 = vadd.f32 %v830_v33, %v719_v14  ;;  %v193_v36 = vpop.f32.mrb[7].mxu0  ;;  %842 = vmatmul.mubr.msk.bf16.vlgmr.msra.gmra.mrb[0].mxu1 %vm276_vm2, %v254_v27 }
  0xeb   :  { %v241_v37 = vmax.f32 %v191_v32, 0.0  ;;  %v194_v38 = vadd.f32 %v719_v14, %v193_v36  ;;  %858 = vmatpush3.bf16.msra.mxu1 %v457_v13 }
  0xec   :  { %v244_v39 = vmax.f32 %v202_v35, 0.0 }
  0xed   :  { %v242_v40 = vmax.f32 %v194_v38, 0.0 }
  0xee   :  { %v256_v41 = vpack.c.bf16 %v244_v39, %v243_v34 }
  0xef   :  { %v255_v42 = vpack.c.bf16 %v242_v40, %v241_v37  ;;  %v833_v43 = vpop.f32.mrb[8].mxu0 }
  0xf0   :  { %v215_v44 = vadd.f32 %v833_v43, %v719_v14  ;;  %v206_v45 = vpop.f32.mrb[9].mxu0 }
  0xf1   :  { %845 = vmatprep.mubr.msk.bf16.mxu1 %vm276_vm2, %v255_v42  ;;  %v207_v46 = vadd.f32 %v719_v14, %v206_v45  ;;  %v834_v47 = vpop.f32.mrb[10].mxu0 }
  0xf2   :  { %846 = vmatmul.mubr.msk.bf16.gmra.mrb[4].mxu1 %vm276_vm2, %v256_v41  ;;  %v247_v48 = vmax.f32 %v215_v44, 0.0  ;;  %v218_v49 = vadd.f32 %v834_v47, %v719_v14  ;;  %v209_v50 = vpop.f32.mrb[11].mxu0 }
  0xf3   :  { %v245_v51 = vmax.f32 %v207_v46, 0.0  ;;  %v210_v52 = vadd.f32 %v719_v14, %v209_v50 }
  0xf4   :  { %v248_v53 = vmax.f32 %v218_v49, 0.0 }
  0xf5   :  { %v246_v54 = vmax.f32 %v210_v52, 0.0 }
  0xf6   :  { %v258_v55 = vpack.c.bf16 %v248_v53, %v247_v48 }
  0xf7   :  { %v257_v56 = vpack.c.bf16 %v246_v54, %v245_v51  ;;  %v837_v57 = vpop.f32.mrb[12].mxu0 }
  0xf8   :  { %v231_v58 = vadd.f32 %v837_v57, %v719_v14  ;;  %v222_v59 = vpop.f32.mrb[13].mxu0 }
  0xf9   :  { %849 = vmatprep.mubr.msk.bf16.mxu1 %vm276_vm2, %v257_v56  ;;  %v223_v60 = vadd.f32 %v719_v14, %v222_v59  ;;  %v838_v61 = vpop.f32.mrb[14].mxu0 }
  0xfa   :  { %850 = vmatmul.mubr.msk.bf16.gmra.mrb[8].mxu1 %vm276_vm2, %v258_v55  ;;  %v251_v62 = vmax.f32 %v231_v58, 0.0  ;;  %v234_v63 = vadd.f32 %v838_v61, %v719_v14  ;;  %v225_v0 = vpop.f32.mrb[15].mxu0 }
  0xfb   :  { %v249_v1 = vmax.f32 %v223_v60, 0.0  ;;  %v226_v2 = vadd.f32 %v719_v14, %v225_v0  ;;  %v984_v0 = vmov 0.0|0.0  }
  0xfc   :  { %v252_v3 = vmax.f32 %v234_v63, 0.0  ;;  %910 = vmatprep.subr.bf16.mxu0 %v984_v0 }
  0xfd   :  { %v250_v4 = vmax.f32 %v226_v2, 0.0  ;;  %v573_v2 = vld [vmem:[#allocation2] sm:$0x1] }
  0xfe   :  { %v260_v5 = vpack.c.bf16 %v252_v3, %v251_v62  ;;  %v987_v3 = vmov 0  }
  0xff   :  { %v259_v6 = vpack.c.bf16 %v250_v4, %v249_v1  ;;  %v986_v1 = vmov 0.0   ;;  %948 = vset.pattern.permute.xlu0 %v987_v3  ;;  %v748_v4 = vld [vmem:[%s1163_s6] ss:$0 sm:$0xff] }
 0x100   :  { %907 = vmatprep.mubr.msk.f32.mxu0 %vm985_vm4, %v986_v1  ;;  %576 = vperm.xlu0 %948, %v573_v2  }
 0x101   :  { %853 = vmatprep.mubr.msk.bf16.mxu1 %vm276_vm2, %v259_v6 }
 0x102   :  { %854 = vmatmul.mubr.msk.bf16.gmra.mrb[12].mxu1 %vm276_vm2, %v260_v5 }
 0x17f   :  { %v577_v3 = vpop.permute.xlu0 %576 }
 0x1bd   :  { %v843_v8 = vpop.f32.mrb[0].mxu1 }
 0x1be   :  { %v344_v9 = vadd.f32 %v843_v8, %v738_v7  ;;  %v335_v10 = vpop.f32.mrb[1].mxu1 }
 0x1bf   :  { %v336_v11 = vadd.f32 %v738_v7, %v335_v10  ;;  %v844_v12 = vpop.f32.mrb[2].mxu1 }
 0x1c0   :  { %v347_v13 = vadd.f32 %v844_v12, %v738_v7  ;;  %v338_v15 = vpop.f32.mrb[3].mxu1  ;;  %v400_v16 = vmax.f32 %v344_v9, 0.0 }
 0x1c1   :  { %v339_v14 = vadd.f32 %v738_v7, %v338_v15  ;;  %v398_v18 = vmax.f32 %v336_v11, 0.0 }
 0x1c2   :  { %v401_v17 = vmax.f32 %v347_v13, 0.0 }
 0x1c3   :  { %v399_v19 = vmax.f32 %v339_v14, 0.0 }
 0x1c4   :  { %v415_v20 = vpack.c.bf16 %v401_v17, %v400_v16 }
 0x1c5   :  { %v414_v21 = vpack.c.bf16 %v399_v19, %v398_v18  ;;  %v847_v22 = vpop.f32.mrb[4].mxu1 }
 0x1c6   :  { %v360_v23 = vadd.f32 %v847_v22, %v738_v7  ;;  %v351_v24 = vpop.f32.mrb[5].mxu1 }
 0x1c7   :  { %v352_v25 = vadd.f32 %v738_v7, %v351_v24  ;;  %v848_v26 = vpop.f32.mrb[6].mxu1  ;;  %859 = vmatprep.mubr.msk.bf16.mxu1 %vm430_vm3, %v414_v21 }
 0x1c8   :  { %v404_v27 = vmax.f32 %v360_v23, 0.0  ;;  %v363_v28 = vadd.f32 %v848_v26, %v738_v7  ;;  %v354_v29 = vpop.f32.mrb[7].mxu1  ;;  %860 = vmatmul.mubr.msk.bf16.vlgmr.msra.gmra.mrb[16].mxu1 %vm430_vm3, %v415_v20 }
 0x1c9   :  { %v402_v30 = vmax.f32 %v352_v25, 0.0  ;;  %v355_v31 = vadd.f32 %v738_v7, %v354_v29 }
 0x1ca   :  { %v405_v32 = vmax.f32 %v363_v28, 0.0 }
 0x1cb   :  { %v403_v33 = vmax.f32 %v355_v31, 0.0 }
 0x1cc   :  { %v417_v34 = vpack.c.bf16 %v405_v32, %v404_v27 }
 0x1cd   :  { %v416_v35 = vpack.c.bf16 %v403_v33, %v402_v30  ;;  %v851_v36 = vpop.f32.mrb[8].mxu1 }
 0x1ce   :  { %v376_v37 = vadd.f32 %v851_v36, %v738_v7  ;;  %v367_v38 = vpop.f32.mrb[9].mxu1 }
 0x1cf   :  { %863 = vmatprep.mubr.msk.bf16.mxu1 %vm430_vm3, %v416_v35  ;;  %v368_v39 = vadd.f32 %v738_v7, %v367_v38  ;;  %v852_v40 = vpop.f32.mrb[10].mxu1 }
 0x1d0   :  { %864 = vmatmul.mubr.msk.bf16.gmra.mrb[20].mxu1 %vm430_vm3, %v417_v34  ;;  %v408_v41 = vmax.f32 %v376_v37, 0.0  ;;  %v379_v42 = vadd.f32 %v852_v40, %v738_v7  ;;  %v370_v43 = vpop.f32.mrb[11].mxu1 }
 0x1d1   :  { %v406_v44 = vmax.f32 %v368_v39, 0.0  ;;  %v371_v45 = vadd.f32 %v738_v7, %v370_v43 }
 0x1d2   :  { %v409_v46 = vmax.f32 %v379_v42, 0.0 }
 0x1d3   :  { %v407_v47 = vmax.f32 %v371_v45, 0.0 }
 0x1d4   :  { %v419_v48 = vpack.c.bf16 %v409_v46, %v408_v41 }
 0x1d5   :  { %v418_v49 = vpack.c.bf16 %v407_v47, %v406_v44  ;;  %v855_v50 = vpop.f32.mrb[12].mxu1 }
 0x1d6   :  { %v392_v51 = vadd.f32 %v855_v50, %v738_v7  ;;  %v383_v52 = vpop.f32.mrb[13].mxu1 }
 0x1d7   :  { %867 = vmatprep.mubr.msk.bf16.mxu1 %vm430_vm3, %v418_v49  ;;  %v384_v53 = vadd.f32 %v738_v7, %v383_v52  ;;  %v856_v54 = vpop.f32.mrb[14].mxu1 }
 0x1d8   :  { %868 = vmatmul.mubr.msk.bf16.gmra.mrb[24].mxu1 %vm430_vm3, %v419_v48  ;;  %v412_v55 = vmax.f32 %v392_v51, 0.0  ;;  %v395_v56 = vadd.f32 %v856_v54, %v738_v7  ;;  %v386_v57 = vpop.f32.mrb[15].mxu1 }
 0x1d9   :  { %v410_v58 = vmax.f32 %v384_v53, 0.0  ;;  %v387_v59 = vadd.f32 %v738_v7, %v386_v57 }
 0x1da   :  { %v413_v60 = vmax.f32 %v395_v56, 0.0 }
 0x1db   :  { %v411_v61 = vmax.f32 %v387_v59, 0.0 }
 0x1dc   :  { %v421_v62 = vpack.c.bf16 %v413_v60, %v412_v55 }
 0x1dd   :  { %v420_v63 = vpack.c.bf16 %v411_v61, %v410_v58 }
 0x1df   :  { %871 = vmatprep.mubr.msk.bf16.mxu1 %vm430_vm3, %v420_v63  ;;  %v579_v63 = vlaneseq }
 0x1e0   :  { %872 = vmatmul.mubr.msk.bf16.gmra.mrb[28].mxu1 %vm430_vm3, %v421_v62  ;;  %v572_v62 = vld [vmem:[%s1164_s7] sm:$0x1] }
 0x1e1   :  { %v580_v1 = vshrl.u32 %v579_v63, 7 }
 0x1e3   :  { %v581_v2 = vsub.s32 0, %v580_v1 }
 0x29b   :  { %v861_v5 = vpop.f32.mrb[16].mxu1 }
 0x29c   :  { %v502_v6 = vadd.f32 %v861_v5, %v748_v4  ;;  %v493_v7 = vpop.f32.mrb[17].mxu1 }
 0x29d   :  { %v494_v8 = vadd.f32 %v748_v4, %v493_v7  ;;  %v862_v9 = vpop.f32.mrb[18].mxu1 }
 0x29e   :  { %v505_v10 = vadd.f32 %v862_v9, %v748_v4  ;;  %v496_v11 = vpop.f32.mrb[19].mxu1  ;;  %v558_v13 = vmax.f32 %v502_v6, 0.0 }
 0x29f   :  { %v497_v12 = vadd.f32 %v748_v4, %v496_v11  ;;  %v556_v14 = vmax.f32 %v494_v8, 0.0 }
 0x2a0   :  { %v559_v15 = vmax.f32 %v505_v10, 0.0 }
 0x2a1   :  { %v557_v16 = vmax.f32 %v497_v12, 0.0 }
 0x2a2   :  { %v915_v17 = vpack.c.bf16 %v559_v15, %v558_v13 }
 0x2a3   :  { %v911_v19 = vpack.c.bf16 %v557_v16, %v556_v14  ;;  %v865_v20 = vpop.f32.mrb[20].mxu1 }
 0x2a4   :  { %v518_v21 = vadd.f32 %v865_v20, %v748_v4  ;;  %v509_v22 = vpop.f32.mrb[21].mxu1 }
 0x2a5   :  { %v510_v23 = vadd.f32 %v748_v4, %v509_v22  ;;  %v866_v24 = vpop.f32.mrb[22].mxu1  ;;  %913 = vmatpush3.bf16.xpose.msk.msra.mxu0 %vm1114_vm5, %v911_v19 }
 0x2a6   :  { %v521_v25 = vadd.f32 %v866_v24, %v748_v4  ;;  %v512_v26 = vpop.f32.mrb[23].mxu1  ;;  %914 = vmatprep.subr.bf16.mxu0 %v984_v0  ;;  %v562_v28 = vmax.f32 %v518_v21, 0.0 }
 0x2a7   :  { %v513_v27 = vadd.f32 %v748_v4, %v512_v26  ;;  %v560_v30 = vmax.f32 %v510_v23, 0.0 }
 0x2a8   :  { %v563_v29 = vmax.f32 %v521_v25, 0.0 }
 0x2a9   :  { %v561_v31 = vmax.f32 %v513_v27, 0.0 }
 0x2aa   :  { %v923_v32 = vpack.c.bf16 %v563_v29, %v562_v28 }
 0x2ab   :  { %v919_v33 = vpack.c.bf16 %v561_v31, %v560_v30  ;;  %v869_v34 = vpop.f32.mrb[24].mxu1 }
 0x2ac   :  { %v534_v35 = vadd.f32 %v869_v34, %v748_v4  ;;  %v525_v36 = vpop.f32.mrb[25].mxu1 }
 0x2ad   :  { %917 = vmatpush3.bf16.xpose.msk.msra.mxu0 %vm1114_vm5, %v915_v17  ;;  %v526_v37 = vadd.f32 %v748_v4, %v525_v36  ;;  %v870_v38 = vpop.f32.mrb[26].mxu1 }
 0x2ae   :  { %v566_v39 = vmax.f32 %v534_v35, 0.0  ;;  %v537_v40 = vadd.f32 %v870_v38, %v748_v4  ;;  %v528_v41 = vpop.f32.mrb[27].mxu1  ;;  %918 = vmatprep.subr.bf16.mxu0 %v984_v0 }
 0x2af   :  { %v564_v42 = vmax.f32 %v526_v37, 0.0  ;;  %v529_v43 = vadd.f32 %v748_v4, %v528_v41 }
 0x2b0   :  { %v567_v44 = vmax.f32 %v537_v40, 0.0 }
 0x2b1   :  { %v565_v45 = vmax.f32 %v529_v43, 0.0 }
 0x2b2   :  { %v931_v46 = vpack.c.bf16 %v567_v44, %v566_v39 }
 0x2b3   :  { %v927_v47 = vpack.c.bf16 %v565_v45, %v564_v42  ;;  %v873_v48 = vpop.f32.mrb[28].mxu1 }
 0x2b4   :  { %v550_v49 = vadd.f32 %v873_v48, %v748_v4  ;;  %v541_v50 = vpop.f32.mrb[29].mxu1 }
 0x2b5   :  { %921 = vmatpush3.bf16.xpose.msk.msra.mxu0 %vm1114_vm5, %v919_v33  ;;  %v542_v51 = vadd.f32 %v748_v4, %v541_v50  ;;  %v874_v52 = vpop.f32.mrb[30].mxu1 }
 0x2b6   :  { %922 = vmatprep.subr.bf16.mxu0 %v984_v0  ;;  %v570_v53 = vmax.f32 %v550_v49, 0.0  ;;  %v553_v54 = vadd.f32 %v874_v52, %v748_v4  ;;  %v544_v55 = vpop.f32.mrb[31].mxu1 }
 0x2b7   :  { %v568_v56 = vmax.f32 %v542_v51, 0.0  ;;  %v545_v57 = vadd.f32 %v748_v4, %v544_v55  ;;  %v582_v4 = vrot.slane %v577_v3, %v581_v2 }
 0x2b8   :  { %v571_v58 = vmax.f32 %v553_v54, 0.0 }
 0x2b9   :  { %v569_v59 = vmax.f32 %v545_v57, 0.0 }
 0x2ba   :  { %v939_v60 = vpack.c.bf16 %v571_v58, %v570_v53 }
 0x2bb   :  { %v935_v61 = vpack.c.bf16 %v569_v59, %v568_v56 }
 0x2bd   :  { %925 = vmatpush3.bf16.xpose.msk.msra.mxu0 %vm1114_vm5, %v923_v32 }
 0x2be   :  { %926 = vmatprep.subr.bf16.mxu0 %v984_v0 }
 0x2c5   :  { %929 = vmatpush3.bf16.xpose.msk.msra.mxu0 %vm1114_vm5, %v927_v47 }
 0x2c6   :  { %930 = vmatprep.subr.bf16.mxu0 %v984_v0 }
 0x2cd   :  { %933 = vmatpush3.bf16.xpose.msk.msra.mxu0 %vm1114_vm5, %v931_v46 }
 0x2ce   :  { %934 = vmatprep.subr.bf16.mxu0 %v984_v0 }
 0x2d5   :  { %937 = vmatpush3.bf16.xpose.msk.msra.mxu0 %vm1114_vm5, %v935_v61 }
 0x2d6   :  { %938 = vmatprep.subr.bf16.mxu0 %v984_v0 }
 0x2dd   :  { %941 = vmatpush3.bf16.xpose.msk.msra.mxu0 %vm1114_vm5, %v939_v60 }
 0x2e4   :  { %908 = vmatmul.mubr.msk.f32.vlgmr.msra.gmra.mrb[16].mxu0 %vm430_vm3, %v572_v62 }
 0x3b7   :  { %v700_v5 = vpop.f32.mrb[16].mxu0 }
 0x3b8   :  { %v701_v6 = vadd.f32 %v700_v5, %v582_v4  ;;  %v909_v7 = vpop.f32.mrb[17].mxu0 }
 0x3ba   :  { %704 = vst [vmem:[#allocation3] sm:$0x1] %v701_v6 }
 0x3bb   :  { %971 = shalt.err (!%p968_p4)
}
 0x3bc   :  { %s972_s18 = scalar_lea.hbm %s1166_s9, 16 }
 0x3bd   :  { %p973_p5 = scmp.ne.s32.totalorder %s1166_s9, %s972_s18  ;;  %p976_p6 = scmp.lt.u32.totalorder %s972_s18, %s1166_s9 }
 0x3bf   :  { %p978_p7 = pnand %p976_p6, %p973_p5 }
 0x3c1   :  { %981 = shalt.err (!%p978_p7)
}
 0x3c2   :  { %714 = dma.vmem_to_hbm [thread:$0]  %s712_s15, 16, %s1166_s9, [#allocation4]  }
 0x3c3   :  { %982 = dma.done.wait [#allocation4], 16  }
 0x3c4   :  { %983 = vsyncadd [#allocation4], 4294967280 }
 0x3c5   :  { %718 = vsyncpa [#allocation4], 1 }

</bundles_post_ra>
